<compile_context>
chip_gen: v5e
topology: v5e:2x2
jax: 0.10.0
libtpu: 0.0.40
codegen_flags: <defaults>
</compile_context>

<pallas_src>
import math
import functools

import jax
import jax.numpy as jnp
from jax.experimental import pallas as pl
from jax.experimental.pallas import tpu as pltpu


LN_EPS = 1e-6  # module's LayerNormalization default


# ----------------------------- Pallas kernels -----------------------------

def _embed_pe_kernel(x_ref, w_ref, b_ref, pe_ref, o_ref):
    # x: (1, S, K) fp32, w: (K, D) bf16, b: (1, D) fp32, pe: (S, D) fp32
    x = x_ref[0].astype(jnp.bfloat16)
    y = jnp.dot(x, w_ref[...], preferred_element_type=jnp.float32)
    o_ref[0] = (y + b_ref[...] + pe_ref[...]).astype(o_ref.dtype)


def embed_with_pe(src, w_bf16, b, pe):
    B, S, K = src.shape
    D = w_bf16.shape[1]
    return pl.pallas_call(
        _embed_pe_kernel,
        out_shape=jax.ShapeDtypeStruct((B, S, D), jnp.float32),
        grid=(B,),
        in_specs=[
            pl.BlockSpec((1, S, K), lambda b_: (b_, 0, 0)),
            pl.BlockSpec((K, D), lambda b_: (0, 0)),
            pl.BlockSpec((1, D), lambda b_: (0, 0)),
            pl.BlockSpec((S, D), lambda b_: (0, 0)),
        ],
        out_specs=pl.BlockSpec((1, S, D), lambda b_: (b_, 0, 0)),
        compiler_params=pltpu.CompilerParams(dimension_semantics=("parallel",)),
    )(src, w_bf16, b, pe)


def _attn_block_kernel(x_ref, wqkv_ref, bqkv_ref, wout_ref, bout_ref,
                       g_ref, be_ref, o_ref, *, nheads, eps):
    # One batch element per grid step.
    # x: (1, S, D) fp32; wqkv: (D, 3D) bf16; wout: (D, D) bf16; biases/LN params: (1, *) fp32
    x = x_ref[0]                                   # (S, D) fp32
    S, D = x.shape
    dh = D // nheads
    scale = 1.0 / math.sqrt(dh)

    xb = x.astype(jnp.bfloat16)
    qkv = jnp.dot(xb, wqkv_ref[...], preferred_element_type=jnp.float32)
    qkv = qkv + bqkv_ref[...]                      # (S, 3D) fp32

    heads = []
    for h in range(nheads):                        # static unroll; in-kernel head split
        q = qkv[:, h * dh:(h + 1) * dh]
        k = qkv[:, D + h * dh:D + (h + 1) * dh]
        v = qkv[:, 2 * D + h * dh:2 * D + (h + 1) * dh]
        # scores = (q @ k^T) * scale  (contract last dims, no explicit transpose)
        s = jax.lax.dot_general(
            q.astype(jnp.bfloat16), k.astype(jnp.bfloat16),
            dimension_numbers=(((1,), (1,)), ((), ())),
            preferred_element_type=jnp.float32) * scale
        m = jnp.max(s, axis=-1, keepdims=True)
        p = jnp.exp(s - m)
        p = p * pl.reciprocal(jnp.sum(p, axis=-1, keepdims=True), approx=True)
        o = jnp.dot(p.astype(jnp.bfloat16), v.astype(jnp.bfloat16),
                    preferred_element_type=jnp.float32)       # (S, dh)
        heads.append(o)

    attn = jnp.concatenate(heads, axis=-1)          # (S, D) fp32
    attn = jnp.dot(attn.astype(jnp.bfloat16), wout_ref[...],
                   preferred_element_type=jnp.float32) + bout_ref[...]

    # residual + LayerNorm (post-LN, fp32)
    z = x + attn
    mean = jnp.mean(z, axis=-1, keepdims=True)
    zc = z - mean
    var = jnp.mean(zc * zc, axis=-1, keepdims=True)
    inv = jax.lax.rsqrt(var + eps)
    o_ref[0] = (zc * inv * g_ref[...] + be_ref[...]).astype(o_ref.dtype)


def attention_block(x3d, wqkv, bqkv, wout, bout, g, be, *, nheads, eps=LN_EPS):
    B, S, D = x3d.shape
    return pl.pallas_call(
        functools.partial(_attn_block_kernel, nheads=nheads, eps=eps),
        out_shape=jax.ShapeDtypeStruct((B, S, D), jnp.float32),
        grid=(B,),
        in_specs=[
            pl.BlockSpec((1, S, D), lambda b_: (b_, 0, 0)),
            pl.BlockSpec((D, 3 * D), lambda b_: (0, 0)),
            pl.BlockSpec((1, 3 * D), lambda b_: (0, 0)),
            pl.BlockSpec((D, D), lambda b_: (0, 0)),
            pl.BlockSpec((1, D), lambda b_: (0, 0)),
            pl.BlockSpec((1, D), lambda b_: (0, 0)),
            pl.BlockSpec((1, D), lambda b_: (0, 0)),
        ],
        out_specs=pl.BlockSpec((1, S, D), lambda b_: (b_, 0, 0)),
        compiler_params=pltpu.CompilerParams(dimension_semantics=("parallel",)),
    )(x3d, wqkv, bqkv, wout, bout, g, be)


def _ffn_block_kernel(x_ref, w1_ref, b1_ref, w2_ref, b2_ref, g_ref, be_ref, o_ref, *, eps):
    # x: (TM, D) fp32; w1: (D, F) bf16; w2: (F, D) bf16
    x = x_ref[...]
    h = jnp.dot(x.astype(jnp.bfloat16), w1_ref[...],
                preferred_element_type=jnp.float32) + b1_ref[...]
    h = jnp.maximum(h, 0.0)                                    # ReLU
    y = jnp.dot(h.astype(jnp.bfloat16), w2_ref[...],
                preferred_element_type=jnp.float32) + b2_ref[...]
    z = x + y                                                  # residual
    mean = jnp.mean(z, axis=-1, keepdims=True)
    zc = z - mean
    var = jnp.mean(zc * zc, axis=-1, keepdims=True)
    inv = jax.lax.rsqrt(var + eps)
    o_ref[...] = (zc * inv * g_ref[...] + be_ref[...]).astype(o_ref.dtype)


def ffn_block(x2d, w1, b1, w2, b2, g, be, *, eps=LN_EPS, block_m=512):
    # Gridded over token rows; weights stay resident in VMEM across steps.
    # TODO(synk): tile the FF hidden dim (K axis) with an accumulator once dim_ff weights
    #             exceed the VMEM budget on v7x (64 MiB physical).
    M, D = x2d.shape
    FF = w1.shape[1]
    tm = M if M <= block_m else block_m
    return pl.pallas_call(
        functools.partial(_ffn_block_kernel, eps=eps),
        out_shape=jax.ShapeDtypeStruct((M, D), jnp.float32),
        grid=(pl.cdiv(M, tm),),
        in_specs=[
            pl.BlockSpec((tm, D), lambda i: (i, 0)),
            pl.BlockSpec((D, FF), lambda i: (0, 0)),
            pl.BlockSpec((1, FF), lambda i: (0, 0)),
            pl.BlockSpec((FF, D), lambda i: (0, 0)),
            pl.BlockSpec((1, D), lambda i: (0, 0)),
            pl.BlockSpec((1, D), lambda i: (0, 0)),
            pl.BlockSpec((1, D), lambda i: (0, 0)),
        ],
        out_specs=pl.BlockSpec((tm, D), lambda i: (i, 0)),
        compiler_params=pltpu.CompilerParams(dimension_semantics=("parallel",)),
    )(x2d, w1, b1, w2, b2, g, be)


def _proj_kernel(x_ref, w_ref, b_ref, o_ref):
    # x: (B, D) fp32; w: (D, Npad) bf16 (zero-padded to a lane-dense 128 multiple)
    y = jnp.dot(x_ref[...].astype(jnp.bfloat16), w_ref[...],
                preferred_element_type=jnp.float32) + b_ref[...]
    o_ref[...] = y.astype(o_ref.dtype)


def projection(last_h, w_pad, b_pad):
    B, _ = last_h.shape
    N = w_pad.shape[1]
    vmem = pl.BlockSpec(memory_space=pltpu.MemorySpace.VMEM)
    return pl.pallas_call(
        _proj_kernel,
        out_shape=jax.ShapeDtypeStruct((B, N), jnp.float32),
        in_specs=[vmem, vmem, vmem],
        out_specs=vmem,
    )(last_h, w_pad, b_pad)


# ----------------------------- model glue -----------------------------

def sinusoidal_pe(max_len, d_model, dtype=jnp.float32):
    position = jnp.arange(max_len, dtype=jnp.float32)[:, None]
    div_term = jnp.exp(jnp.arange(0, d_model, 2, dtype=jnp.float32)
                       * (-math.log(10000.0) / d_model))
    pe = jnp.zeros((max_len, d_model), dtype=jnp.float32)
    pe = pe.at[:, 0::2].set(jnp.sin(position * div_term))
    pe = pe.at[:, 1::2].set(jnp.cos(position * div_term))
    return pe.astype(dtype)


def _round_up(x, m):
    return ((x + m - 1) // m) * m


def init_params(key, *, input_dim, d_model, num_layers, dim_ff,
                future_len, output_dim, max_len=5000):
    def nxt():
        nonlocal key
        key, sub = jax.random.split(key)
        return sub

    def dense(k_in, k_out):
        return (0.02 * jax.random.normal(nxt(), (k_in, k_out), jnp.float32),
                jnp.zeros((k_out,), jnp.float32))

    params = {}
    params["emb_w"], params["emb_b"] = dense(input_dim, d_model)
    params["pe"] = sinusoidal_pe(max_len, d_model)

    layers = []
    for _ in range(num_layers):
        lyr = {}
        lyr["w_qkv"], lyr["b_qkv"] = dense(d_model, 3 * d_model)
        lyr["w_out"], lyr["b_out"] = dense(d_model, d_model)
        lyr["ln1_g"] = jnp.ones((d_model,), jnp.float32)
        lyr["ln1_b"] = jnp.zeros((d_model,), jnp.float32)
        lyr["w_ff1"], lyr["b_ff1"] = dense(d_model, dim_ff)
        lyr["w_ff2"], lyr["b_ff2"] = dense(dim_ff, d_model)
        lyr["ln2_g"] = jnp.ones((d_model,), jnp.float32)
        lyr["ln2_b"] = jnp.zeros((d_model,), jnp.float32)
        layers.append(lyr)
    params["layers"] = layers

    # Projection3D weight (d_model, future_len, output_dim), bias (future_len, output_dim);
    # stored flattened and zero-padded to a lane-dense (multiple-of-128) output width.
    n_out = future_len * output_dim
    n_pad = _round_up(max(n_out, 128), 128)
    proj_w = 0.02 * jax.random.normal(nxt(), (d_model, n_out), jnp.float32)
    params["proj_w_pad"] = jnp.pad(proj_w, ((0, 0), (0, n_pad - n_out)))
    params["proj_b_pad"] = jnp.zeros((1, n_pad), jnp.float32)
    return params


def transformer_forward(params, src, *, nheads, future_len, output_dim):
    # src: (B, S, input_dim)  ->  (B, future_len, output_dim)
    B, S, _ = src.shape
    D = params["emb_w"].shape[1]
    bf16 = jnp.bfloat16

    # InputEmbeddings + PositionalEncoding fused into one kernel (no PE broadcast in HBM).
    x = embed_with_pe(src,
                      params["emb_w"].astype(bf16),
                      params["emb_b"].reshape(1, D),
                      params["pe"][:S])                        # (B, S, D) fp32

    # Encoder stack (post-LN residual connections, as in the reference module).
    for lyr in params["layers"]:
        x = attention_block(x,
                            lyr["w_qkv"].astype(bf16), lyr["b_qkv"].reshape(1, 3 * D),
                            lyr["w_out"].astype(bf16), lyr["b_out"].reshape(1, D),
                            lyr["ln1_g"].reshape(1, D), lyr["ln1_b"].reshape(1, D),
                            nheads=nheads)
        x = ffn_block(x.reshape(B * S, D),
                      lyr["w_ff1"].astype(bf16), lyr["b_ff1"].reshape(1, -1),
                      lyr["w_ff2"].astype(bf16), lyr["b_ff2"].reshape(1, D),
                      lyr["ln2_g"].reshape(1, D), lyr["ln2_b"].reshape(1, D),
                      ).reshape(B, S, D)

    # Last hidden state of the sequence, then Projection3D (lane-dense padded matmul).
    last_h = x[:, -1, :]                                       # (B, D)
    out_pad = projection(last_h,
                         params["proj_w_pad"].astype(bf16),
                         params["proj_b_pad"])                 # (B, Npad)
    out = out_pad[:, :future_len * output_dim].reshape(B, future_len, output_dim)
    return out


# TODO(synk): attn_mask / key_padding_mask are not supported (the reference forward passes None).


# ----------------------------- main -----------------------------

if __name__ == "__main__":
    # Small shapes consistent with the module's forward contract.
    B, S = 2, 8
    input_dim, d_model, nheads = 32, 32, 4
    num_layers, dim_ff = 2, 64
    future_len, output_dim = 15, 2

    key = jax.random.PRNGKey(0)
    pkey, xkey = jax.random.split(key)
    params = init_params(pkey, input_dim=input_dim, d_model=d_model,
                         num_layers=num_layers, dim_ff=dim_ff,
                         future_len=future_len, output_dim=output_dim,
                         max_len=64)

    src = jax.random.normal(xkey, (B, S, input_dim), jnp.float32)

    forward = jax.jit(functools.partial(transformer_forward, nheads=nheads,
                                        future_len=future_len,
                                        output_dim=output_dim))
    out = forward(params, src)
    out = jax.block_until_ready(out)

    assert out.shape == (B, future_len, output_dim), out.shape
    assert jnp.all(jnp.isfinite(out))
    print("KERNEL_OK")
</pallas_src>

<mosaic_0001>
module attributes {stable_mosaic.version = 11 : i64} {
  func.func @_embed_pe_kernel(%arg0: i32, %arg1: memref<1x8x32xf32, #tpu.memory_space<vmem>>, %arg2: memref<32x32xbf16, #tpu.memory_space<vmem>>, %arg3: memref<1x32xf32, #tpu.memory_space<vmem>>, %arg4: memref<8x32xf32, #tpu.memory_space<vmem>>, %arg5: memref<1x8x32xf32, #tpu.memory_space<vmem>>) attributes {dimension_semantics = [#tpu.dimension_semantics<parallel>], iteration_bounds = array<i64: 2>, scalar_prefetch = 0 : i64, scratch_operands = 0 : i64, tpu.core_type = #tpu.core_type<tc>, window_params = [{transform_indices = @transform_0, window_bounds = array<i64: 1, 8, 32>}, {pipeline_mode = #tpu.pipeline_mode<synchronous>, transform_indices = @transform_1, window_bounds = array<i64: 32, 32>}, {pipeline_mode = #tpu.pipeline_mode<synchronous>, transform_indices = @transform_2, window_bounds = array<i64: 1, 32>}, {pipeline_mode = #tpu.pipeline_mode<synchronous>, transform_indices = @transform_3, window_bounds = array<i64: 8, 32>}, {transform_indices = @transform_4, window_bounds = array<i64: 1, 8, 32>}]} {
    %c0 = arith.constant 0 : index
    %c0_0 = arith.constant 0 : index
    %c0_1 = arith.constant 0 : index
    %0 = vector.load %arg1[%c0, %c0_0, %c0_1] : memref<1x8x32xf32, #tpu.memory_space<vmem>>, vector<1x8x32xf32>
    %1 = vector.shape_cast %0 : vector<1x8x32xf32> to vector<8x32xf32>
    %2 = arith.truncf %1 : vector<8x32xf32> to vector<8x32xbf16>
    %c0_2 = arith.constant 0 : index
    %c0_3 = arith.constant 0 : index
    %3 = vector.load %arg2[%c0_2, %c0_3] : memref<32x32xbf16, #tpu.memory_space<vmem>>, vector<32x32xbf16>
    %cst = arith.constant dense<0.000000e+00> : vector<8x32xf32>
    %4 = tpu.matmul %2, %3, %cst {dimension_numbers = #tpu.dot_dimension_numbers<[1], [0], [0], [1], [0, 0, 1, 1], [], []>} : vector<8x32xbf16>, vector<32x32xbf16>, vector<8x32xf32> -> vector<8x32xf32>
    %c0_4 = arith.constant 0 : index
    %c0_5 = arith.constant 0 : index
    %5 = vector.load %arg3[%c0_4, %c0_5] : memref<1x32xf32, #tpu.memory_space<vmem>>, vector<1x32xf32>
    %6 = vector.broadcast %5 : vector<1x32xf32> to vector<8x32xf32>
    %7 = arith.addf %4, %6 : vector<8x32xf32>
    %c0_6 = arith.constant 0 : index
    %c0_7 = arith.constant 0 : index
    %8 = vector.load %arg4[%c0_6, %c0_7] : memref<8x32xf32, #tpu.memory_space<vmem>>, vector<8x32xf32>
    %9 = arith.addf %7, %8 : vector<8x32xf32>
    %c0_8 = arith.constant 0 : index
    %c0_9 = arith.constant 0 : index
    %c0_10 = arith.constant 0 : index
    %10 = vector.load %arg5[%c0_8, %c0_9, %c0_10] : memref<1x8x32xf32, #tpu.memory_space<vmem>>, vector<1x8x32xf32>
    %11 = vector.shape_cast %10 : vector<1x8x32xf32> to vector<8x32xf32>
    %12 = vector.shape_cast %9 : vector<8x32xf32> to vector<1x8x32xf32>
    tpu.vector_store %arg5[%c0_8, %c0_9, %c0_10], %12 {strides = array<i32>} : memref<1x8x32xf32, #tpu.memory_space<vmem>>, vector<1x8x32xf32>,
    return
  }
  func.func @transform_0(%arg0: i32) -> (i32, i32, i32) {
    %c0_i32 = arith.constant 0 : i32
    %c0_i32_0 = arith.constant 0 : i32
    %c0_i32_1 = arith.constant 0 : i32
    return %arg0, %c0_i32, %c0_i32_0 : i32, i32, i32
  }
  func.func @transform_1(%arg0: i32) -> (i32, i32) {
    %c0_i32 = arith.constant 0 : i32
    %c0_i32_0 = arith.constant 0 : i32
    %c0_i32_1 = arith.constant 0 : i32
    return %c0_i32, %c0_i32_0 : i32, i32
  }
  func.func @transform_2(%arg0: i32) -> (i32, i32) {
    %c0_i32 = arith.constant 0 : i32
    %c0_i32_0 = arith.constant 0 : i32
    %c0_i32_1 = arith.constant 0 : i32
    return %c0_i32, %c0_i32_0 : i32, i32
  }
  func.func @transform_3(%arg0: i32) -> (i32, i32) {
    %c0_i32 = arith.constant 0 : i32
    %c0_i32_0 = arith.constant 0 : i32
    %c0_i32_1 = arith.constant 0 : i32
    return %c0_i32, %c0_i32_0 : i32, i32
  }
  func.func @transform_4(%arg0: i32) -> (i32, i32, i32) {
    %c0_i32 = arith.constant 0 : i32
    %c0_i32_0 = arith.constant 0 : i32
    %c0_i32_1 = arith.constant 0 : i32
    return %arg0, %c0_i32, %c0_i32_0 : i32, i32, i32
  }
}

module attributes {stable_mosaic.version = 11 : i64} {
  func.func @_proj_kernel(%arg0: memref<2x32xf32, #tpu.memory_space<vmem>>, %arg1: memref<32x128xbf16, #tpu.memory_space<vmem>>, %arg2: memref<1x128xf32, #tpu.memory_space<vmem>>, %arg3: memref<2x128xf32, #tpu.memory_space<vmem>>) attributes {dimension_semantics = [], scalar_prefetch = 0 : i64, scratch_operands = 0 : i64, tpu.core_type = #tpu.core_type<tc>} {
    %c0 = arith.constant 0 : index
    %c0_0 = arith.constant 0 : index
    %0 = vector.load %arg0[%c0, %c0_0] : memref<2x32xf32, #tpu.memory_space<vmem>>, vector<2x32xf32>
    %1 = arith.truncf %0 : vector<2x32xf32> to vector<2x32xbf16>
    %c0_1 = arith.constant 0 : index
    %c0_2 = arith.constant 0 : index
    %2 = vector.load %arg1[%c0_1, %c0_2] : memref<32x128xbf16, #tpu.memory_space<vmem>>, vector<32x128xbf16>
    %cst = arith.constant dense<0.000000e+00> : vector<2x128xf32>
    %3 = tpu.matmul %1, %2, %cst {dimension_numbers = #tpu.dot_dimension_numbers<[1], [0], [0], [1], [0, 0, 1, 1], [], []>} : vector<2x32xbf16>, vector<32x128xbf16>, vector<2x128xf32> -> vector<2x128xf32>
    %c0_3 = arith.constant 0 : index
    %c0_4 = arith.constant 0 : index
    %4 = vector.load %arg2[%c0_3, %c0_4] : memref<1x128xf32, #tpu.memory_space<vmem>>, vector<1x128xf32>
    %5 = vector.broadcast %4 : vector<1x128xf32> to vector<2x128xf32>
    %6 = arith.addf %3, %5 : vector<2x128xf32>
    %c0_5 = arith.constant 0 : index
    %c0_6 = arith.constant 0 : index
    %7 = vector.load %arg3[%c0_5, %c0_6] : memref<2x128xf32, #tpu.memory_space<vmem>>, vector<2x128xf32>
    tpu.vector_store %arg3[%c0_5, %c0_6], %6 {strides = array<i32>} : memref<2x128xf32, #tpu.memory_space<vmem>>, vector<2x128xf32>,
    return
  }
}

module attributes {stable_mosaic.version = 11 : i64} {
  func.func @_attn_block_kernel(%arg0: i32, %arg1: memref<1x8x32xf32, #tpu.memory_space<vmem>>, %arg2: memref<32x96xbf16, #tpu.memory_space<vmem>>, %arg3: memref<1x96xf32, #tpu.memory_space<vmem>>, %arg4: memref<32x32xbf16, #tpu.memory_space<vmem>>, %arg5: memref<1x32xf32, #tpu.memory_space<vmem>>, %arg6: memref<1x32xf32, #tpu.memory_space<vmem>>, %arg7: memref<1x32xf32, #tpu.memory_space<vmem>>, %arg8: memref<1x8x32xf32, #tpu.memory_space<vmem>>) attributes {dimension_semantics = [#tpu.dimension_semantics<parallel>], iteration_bounds = array<i64: 2>, scalar_prefetch = 0 : i64, scratch_operands = 0 : i64, tpu.core_type = #tpu.core_type<tc>, window_params = [{transform_indices = @transform_0, window_bounds = array<i64: 1, 8, 32>}, {pipeline_mode = #tpu.pipeline_mode<synchronous>, transform_indices = @transform_1, window_bounds = array<i64: 32, 96>}, {pipeline_mode = #tpu.pipeline_mode<synchronous>, transform_indices = @transform_2, window_bounds = array<i64: 1, 96>}, {pipeline_mode = #tpu.pipeline_mode<synchronous>, transform_indices = @transform_3, window_bounds = array<i64: 32, 32>}, {pipeline_mode = #tpu.pipeline_mode<synchronous>, transform_indices = @transform_4, window_bounds = array<i64: 1, 32>}, {pipeline_mode = #tpu.pipeline_mode<synchronous>, transform_indices = @transform_5, window_bounds = array<i64: 1, 32>}, {pipeline_mode = #tpu.pipeline_mode<synchronous>, transform_indices = @transform_6, window_bounds = array<i64: 1, 32>}, {transform_indices = @transform_7, window_bounds = array<i64: 1, 8, 32>}]} {
    %c0 = arith.constant 0 : index
    %c0_0 = arith.constant 0 : index
    %c0_1 = arith.constant 0 : index
    %0 = vector.load %arg1[%c0, %c0_0, %c0_1] : memref<1x8x32xf32, #tpu.memory_space<vmem>>, vector<1x8x32xf32>
    %1 = vector.shape_cast %0 : vector<1x8x32xf32> to vector<8x32xf32>
    %2 = arith.truncf %1 : vector<8x32xf32> to vector<8x32xbf16>
    %c0_2 = arith.constant 0 : index
    %c0_3 = arith.constant 0 : index
    %3 = vector.load %arg2[%c0_2, %c0_3] : memref<32x96xbf16, #tpu.memory_space<vmem>>, vector<32x96xbf16>
    %cst = arith.constant dense<0.000000e+00> : vector<8x96xf32>
    %4 = tpu.matmul %2, %3, %cst {dimension_numbers = #tpu.dot_dimension_numbers<[1], [0], [0], [1], [0, 0, 1, 1], [], []>} : vector<8x32xbf16>, vector<32x96xbf16>, vector<8x96xf32> -> vector<8x96xf32>
    %c0_4 = arith.constant 0 : index
    %c0_5 = arith.constant 0 : index
    %5 = vector.load %arg3[%c0_4, %c0_5] : memref<1x96xf32, #tpu.memory_space<vmem>>, vector<1x96xf32>
    %6 = vector.broadcast %5 : vector<1x96xf32> to vector<8x96xf32>
    %7 = arith.addf %4, %6 : vector<8x96xf32>
    %8 = vector.extract_strided_slice %7 {offsets = [0, 0], sizes = [8, 8], strides = [1, 1]} : vector<8x96xf32> to vector<8x8xf32>
    %9 = vector.extract_strided_slice %7 {offsets = [0, 32], sizes = [8, 8], strides = [1, 1]} : vector<8x96xf32> to vector<8x8xf32>
    %10 = vector.extract_strided_slice %7 {offsets = [0, 64], sizes = [8, 8], strides = [1, 1]} : vector<8x96xf32> to vector<8x8xf32>
    %11 = arith.truncf %8 : vector<8x8xf32> to vector<8x8xbf16>
    %12 = arith.truncf %9 : vector<8x8xf32> to vector<8x8xbf16>
    %cst_6 = arith.constant dense<0.000000e+00> : vector<8x8xf32>
    %13 = tpu.matmul %11, %12, %cst_6 {dimension_numbers = #tpu.dot_dimension_numbers<[1], [1], [0], [0], [0, 0, 1, 0], [], []>} : vector<8x8xbf16>, vector<8x8xbf16>, vector<8x8xf32> -> vector<8x8xf32>
    %cst_7 = arith.constant 0.353553385 : f32
    %14 = vector.broadcast %cst_7 : f32 to vector<8x8xf32>
    %15 = arith.mulf %13, %14 : vector<8x8xf32>
    %cst_8 = arith.constant dense<0xFF800000> : vector<8xf32>
    %16 = vector.multi_reduction <maximumf>, %15, %cst_8 [1] : vector<8x8xf32> to vector<8xf32>
    %17 = vector.shape_cast %16 : vector<8xf32> to vector<8x1xf32>
    %18 = vector.broadcast %17 : vector<8x1xf32> to vector<8x8xf32>
    %19 = arith.subf %15, %18 : vector<8x8xf32>
    %20 = math.exp %19 : vector<8x8xf32>
    %cst_9 = arith.constant dense<0.000000e+00> : vector<8xf32>
    %21 = vector.multi_reduction <add>, %20, %cst_9 [1] : vector<8x8xf32> to vector<8xf32>
    %22 = vector.shape_cast %21 : vector<8xf32> to vector<8x1xf32>
    %23 = tpu.reciprocal %22 {approx = true} : vector<8x1xf32> -> vector<8x1xf32>
    %24 = vector.broadcast %23 : vector<8x1xf32> to vector<8x8xf32>
    %25 = arith.mulf %20, %24 : vector<8x8xf32>
    %26 = arith.truncf %25 : vector<8x8xf32> to vector<8x8xbf16>
    %27 = arith.truncf %10 : vector<8x8xf32> to vector<8x8xbf16>
    %cst_10 = arith.constant dense<0.000000e+00> : vector<8x8xf32>
    %28 = tpu.matmul %26, %27, %cst_10 {dimension_numbers = #tpu.dot_dimension_numbers<[1], [0], [0], [1], [0, 0, 1, 1], [], []>} : vector<8x8xbf16>, vector<8x8xbf16>, vector<8x8xf32> -> vector<8x8xf32>
    %29 = vector.extract_strided_slice %7 {offsets = [0, 8], sizes = [8, 8], strides = [1, 1]} : vector<8x96xf32> to vector<8x8xf32>
    %30 = vector.extract_strided_slice %7 {offsets = [0, 40], sizes = [8, 8], strides = [1, 1]} : vector<8x96xf32> to vector<8x8xf32>
    %31 = vector.extract_strided_slice %7 {offsets = [0, 72], sizes = [8, 8], strides = [1, 1]} : vector<8x96xf32> to vector<8x8xf32>
    %32 = arith.truncf %29 : vector<8x8xf32> to vector<8x8xbf16>
    %33 = arith.truncf %30 : vector<8x8xf32> to vector<8x8xbf16>
    %cst_11 = arith.constant dense<0.000000e+00> : vector<8x8xf32>
    %34 = tpu.matmul %32, %33, %cst_11 {dimension_numbers = #tpu.dot_dimension_numbers<[1], [1], [0], [0], [0, 0, 1, 0], [], []>} : vector<8x8xbf16>, vector<8x8xbf16>, vector<8x8xf32> -> vector<8x8xf32>
    %cst_12 = arith.constant 0.353553385 : f32
    %35 = vector.broadcast %cst_12 : f32 to vector<8x8xf32>
    %36 = arith.mulf %34, %35 : vector<8x8xf32>
    %cst_13 = arith.constant dense<0xFF800000> : vector<8xf32>
    %37 = vector.multi_reduction <maximumf>, %36, %cst_13 [1] : vector<8x8xf32> to vector<8xf32>
    %38 = vector.shape_cast %37 : vector<8xf32> to vector<8x1xf32>
    %39 = vector.broadcast %38 : vector<8x1xf32> to vector<8x8xf32>
    %40 = arith.subf %36, %39 : vector<8x8xf32>
    %41 = math.exp %40 : vector<8x8xf32>
    %cst_14 = arith.constant dense<0.000000e+00> : vector<8xf32>
    %42 = vector.multi_reduction <add>, %41, %cst_14 [1] : vector<8x8xf32> to vector<8xf32>
    %43 = vector.shape_cast %42 : vector<8xf32> to vector<8x1xf32>
    %44 = tpu.reciprocal %43 {approx = true} : vector<8x1xf32> -> vector<8x1xf32>
    %45 = vector.broadcast %44 : vector<8x1xf32> to vector<8x8xf32>
    %46 = arith.mulf %41, %45 : vector<8x8xf32>
    %47 = arith.truncf %46 : vector<8x8xf32> to vector<8x8xbf16>
    %48 = arith.truncf %31 : vector<8x8xf32> to vector<8x8xbf16>
    %cst_15 = arith.constant dense<0.000000e+00> : vector<8x8xf32>
    %49 = tpu.matmul %47, %48, %cst_15 {dimension_numbers = #tpu.dot_dimension_numbers<[1], [0], [0], [1], [0, 0, 1, 1], [], []>} : vector<8x8xbf16>, vector<8x8xbf16>, vector<8x8xf32> -> vector<8x8xf32>
    %50 = vector.extract_strided_slice %7 {offsets = [0, 16], sizes = [8, 8], strides = [1, 1]} : vector<8x96xf32> to vector<8x8xf32>
    %51 = vector.extract_strided_slice %7 {offsets = [0, 48], sizes = [8, 8], strides = [1, 1]} : vector<8x96xf32> to vector<8x8xf32>
    %52 = vector.extract_strided_slice %7 {offsets = [0, 80], sizes = [8, 8], strides = [1, 1]} : vector<8x96xf32> to vector<8x8xf32>
    %53 = arith.truncf %50 : vector<8x8xf32> to vector<8x8xbf16>
    %54 = arith.truncf %51 : vector<8x8xf32> to vector<8x8xbf16>
    %cst_16 = arith.constant dense<0.000000e+00> : vector<8x8xf32>
    %55 = tpu.matmul %53, %54, %cst_16 {dimension_numbers = #tpu.dot_dimension_numbers<[1], [1], [0], [0], [0, 0, 1, 0], [], []>} : vector<8x8xbf16>, vector<8x8xbf16>, vector<8x8xf32> -> vector<8x8xf32>
    %cst_17 = arith.constant 0.353553385 : f32
    %56 = vector.broadcast %cst_17 : f32 to vector<8x8xf32>
    %57 = arith.mulf %55, %56 : vector<8x8xf32>
    %cst_18 = arith.constant dense<0xFF800000> : vector<8xf32>
    %58 = vector.multi_reduction <maximumf>, %57, %cst_18 [1] : vector<8x8xf32> to vector<8xf32>
    %59 = vector.shape_cast %58 : vector<8xf32> to vector<8x1xf32>
    %60 = vector.broadcast %59 : vector<8x1xf32> to vector<8x8xf32>
    %61 = arith.subf %57, %60 : vector<8x8xf32>
    %62 = math.exp %61 : vector<8x8xf32>
    %cst_19 = arith.constant dense<0.000000e+00> : vector<8xf32>
    %63 = vector.multi_reduction <add>, %62, %cst_19 [1] : vector<8x8xf32> to vector<8xf32>
    %64 = vector.shape_cast %63 : vector<8xf32> to vector<8x1xf32>
    %65 = tpu.reciprocal %64 {approx = true} : vector<8x1xf32> -> vector<8x1xf32>
    %66 = vector.broadcast %65 : vector<8x1xf32> to vector<8x8xf32>
    %67 = arith.mulf %62, %66 : vector<8x8xf32>
    %68 = arith.truncf %67 : vector<8x8xf32> to vector<8x8xbf16>
    %69 = arith.truncf %52 : vector<8x8xf32> to vector<8x8xbf16>
    %cst_20 = arith.constant dense<0.000000e+00> : vector<8x8xf32>
    %70 = tpu.matmul %68, %69, %cst_20 {dimension_numbers = #tpu.dot_dimension_numbers<[1], [0], [0], [1], [0, 0, 1, 1], [], []>} : vector<8x8xbf16>, vector<8x8xbf16>, vector<8x8xf32> -> vector<8x8xf32>
    %71 = vector.extract_strided_slice %7 {offsets = [0, 24], sizes = [8, 8], strides = [1, 1]} : vector<8x96xf32> to vector<8x8xf32>
    %72 = vector.extract_strided_slice %7 {offsets = [0, 56], sizes = [8, 8], strides = [1, 1]} : vector<8x96xf32> to vector<8x8xf32>
    %73 = vector.extract_strided_slice %7 {offsets = [0, 88], sizes = [8, 8], strides = [1, 1]} : vector<8x96xf32> to vector<8x8xf32>
    %74 = arith.truncf %71 : vector<8x8xf32> to vector<8x8xbf16>
    %75 = arith.truncf %72 : vector<8x8xf32> to vector<8x8xbf16>
    %cst_21 = arith.constant dense<0.000000e+00> : vector<8x8xf32>
    %76 = tpu.matmul %74, %75, %cst_21 {dimension_numbers = #tpu.dot_dimension_numbers<[1], [1], [0], [0], [0, 0, 1, 0], [], []>} : vector<8x8xbf16>, vector<8x8xbf16>, vector<8x8xf32> -> vector<8x8xf32>
    %cst_22 = arith.constant 0.353553385 : f32
    %77 = vector.broadcast %cst_22 : f32 to vector<8x8xf32>
    %78 = arith.mulf %76, %77 : vector<8x8xf32>
    %cst_23 = arith.constant dense<0xFF800000> : vector<8xf32>
    %79 = vector.multi_reduction <maximumf>, %78, %cst_23 [1] : vector<8x8xf32> to vector<8xf32>
    %80 = vector.shape_cast %79 : vector<8xf32> to vector<8x1xf32>
    %81 = vector.broadcast %80 : vector<8x1xf32> to vector<8x8xf32>
    %82 = arith.subf %78, %81 : vector<8x8xf32>
    %83 = math.exp %82 : vector<8x8xf32>
    %cst_24 = arith.constant dense<0.000000e+00> : vector<8xf32>
    %84 = vector.multi_reduction <add>, %83, %cst_24 [1] : vector<8x8xf32> to vector<8xf32>
    %85 = vector.shape_cast %84 : vector<8xf32> to vector<8x1xf32>
    %86 = tpu.reciprocal %85 {approx = true} : vector<8x1xf32> -> vector<8x1xf32>
    %87 = vector.broadcast %86 : vector<8x1xf32> to vector<8x8xf32>
    %88 = arith.mulf %83, %87 : vector<8x8xf32>
    %89 = arith.truncf %88 : vector<8x8xf32> to vector<8x8xbf16>
    %90 = arith.truncf %73 : vector<8x8xf32> to vector<8x8xbf16>
    %cst_25 = arith.constant dense<0.000000e+00> : vector<8x8xf32>
    %91 = tpu.matmul %89, %90, %cst_25 {dimension_numbers = #tpu.dot_dimension_numbers<[1], [0], [0], [1], [0, 0, 1, 1], [], []>} : vector<8x8xbf16>, vector<8x8xbf16>, vector<8x8xf32> -> vector<8x8xf32>
    %92 = tpu.concatenate %28, %49, %70, %91 in 1 : vector<8x8xf32>, vector<8x8xf32>, vector<8x8xf32>, vector<8x8xf32> -> vector<8x32xf32>
    %93 = arith.truncf %92 : vector<8x32xf32> to vector<8x32xbf16>
    %c0_26 = arith.constant 0 : index
    %c0_27 = arith.constant 0 : index
    %94 = vector.load %arg4[%c0_26, %c0_27] : memref<32x32xbf16, #tpu.memory_space<vmem>>, vector<32x32xbf16>
    %cst_28 = arith.constant dense<0.000000e+00> : vector<8x32xf32>
    %95 = tpu.matmul %93, %94, %cst_28 {dimension_numbers = #tpu.dot_dimension_numbers<[1], [0], [0], [1], [0, 0, 1, 1], [], []>} : vector<8x32xbf16>, vector<32x32xbf16>, vector<8x32xf32> -> vector<8x32xf32>
    %c0_29 = arith.constant 0 : index
    %c0_30 = arith.constant 0 : index
    %96 = vector.load %arg5[%c0_29, %c0_30] : memref<1x32xf32, #tpu.memory_space<vmem>>, vector<1x32xf32>
    %97 = vector.broadcast %96 : vector<1x32xf32> to vector<8x32xf32>
    %98 = arith.addf %95, %97 : vector<8x32xf32>
    %99 = arith.addf %1, %98 : vector<8x32xf32>
    %cst_31 = arith.constant dense<0.000000e+00> : vector<8xf32>
    %100 = vector.multi_reduction <add>, %99, %cst_31 [1] : vector<8x32xf32> to vector<8xf32>
    %101 = vector.shape_cast %100 : vector<8xf32> to vector<8x1xf32>
    %cst_32 = arith.constant 3.200000e+01 : f32
    %102 = vector.broadcast %cst_32 : f32 to vector<8x1xf32>
    %103 = arith.divf %101, %102 : vector<8x1xf32>
    %104 = vector.broadcast %103 : vector<8x1xf32> to vector<8x32xf32>
    %105 = arith.subf %99, %104 : vector<8x32xf32>
    %106 = arith.mulf %105, %105 : vector<8x32xf32>
    %cst_33 = arith.constant dense<0.000000e+00> : vector<8xf32>
    %107 = vector.multi_reduction <add>, %106, %cst_33 [1] : vector<8x32xf32> to vector<8xf32>
    %108 = vector.shape_cast %107 : vector<8xf32> to vector<8x1xf32>
    %cst_34 = arith.constant 3.200000e+01 : f32
    %109 = vector.broadcast %cst_34 : f32 to vector<8x1xf32>
    %110 = arith.divf %108, %109 : vector<8x1xf32>
    %cst_35 = arith.constant 9.99999997E-7 : f32
    %111 = vector.broadcast %cst_35 : f32 to vector<8x1xf32>
    %112 = arith.addf %110, %111 : vector<8x1xf32>
    %113 = math.rsqrt %112 : vector<8x1xf32>
    %114 = vector.broadcast %113 : vector<8x1xf32> to vector<8x32xf32>
    %115 = arith.mulf %105, %114 : vector<8x32xf32>
    %c0_36 = arith.constant 0 : index
    %c0_37 = arith.constant 0 : index
    %116 = vector.load %arg6[%c0_36, %c0_37] : memref<1x32xf32, #tpu.memory_space<vmem>>, vector<1x32xf32>
    %117 = vector.broadcast %116 : vector<1x32xf32> to vector<8x32xf32>
    %118 = arith.mulf %115, %117 : vector<8x32xf32>
    %c0_38 = arith.constant 0 : index
    %c0_39 = arith.constant 0 : index
    %119 = vector.load %arg7[%c0_38, %c0_39] : memref<1x32xf32, #tpu.memory_space<vmem>>, vector<1x32xf32>
    %120 = vector.broadcast %119 : vector<1x32xf32> to vector<8x32xf32>
    %121 = arith.addf %118, %120 : vector<8x32xf32>
    %c0_40 = arith.constant 0 : index
    %c0_41 = arith.constant 0 : index
    %c0_42 = arith.constant 0 : index
    %122 = vector.load %arg8[%c0_40, %c0_41, %c0_42] : memref<1x8x32xf32, #tpu.memory_space<vmem>>, vector<1x8x32xf32>
    %123 = vector.shape_cast %122 : vector<1x8x32xf32> to vector<8x32xf32>
    %124 = vector.shape_cast %121 : vector<8x32xf32> to vector<1x8x32xf32>
    tpu.vector_store %arg8[%c0_40, %c0_41, %c0_42], %124 {strides = array<i32>} : memref<1x8x32xf32, #tpu.memory_space<vmem>>, vector<1x8x32xf32>,
    return
  }
  func.func @transform_0(%arg0: i32) -> (i32, i32, i32) {
    %c0_i32 = arith.constant 0 : i32
    %c0_i32_0 = arith.constant 0 : i32
    %c0_i32_1 = arith.constant 0 : i32
    return %arg0, %c0_i32, %c0_i32_0 : i32, i32, i32
  }
  func.func @transform_1(%arg0: i32) -> (i32, i32) {
    %c0_i32 = arith.constant 0 : i32
    %c0_i32_0 = arith.constant 0 : i32
    %c0_i32_1 = arith.constant 0 : i32
    return %c0_i32, %c0_i32_0 : i32, i32
  }
  func.func @transform_2(%arg0: i32) -> (i32, i32) {
    %c0_i32 = arith.constant 0 : i32
    %c0_i32_0 = arith.constant 0 : i32
    %c0_i32_1 = arith.constant 0 : i32
    return %c0_i32, %c0_i32_0 : i32, i32
  }
  func.func @transform_3(%arg0: i32) -> (i32, i32) {
    %c0_i32 = arith.constant 0 : i32
    %c0_i32_0 = arith.constant 0 : i32
    %c0_i32_1 = arith.constant 0 : i32
    return %c0_i32, %c0_i32_0 : i32, i32
  }
  func.func @transform_4(%arg0: i32) -> (i32, i32) {
    %c0_i32 = arith.constant 0 : i32
    %c0_i32_0 = arith.constant 0 : i32
    %c0_i32_1 = arith.constant 0 : i32
    return %c0_i32, %c0_i32_0 : i32, i32
  }
  func.func @transform_5(%arg0: i32) -> (i32, i32) {
    %c0_i32 = arith.constant 0 : i32
    %c0_i32_0 = arith.constant 0 : i32
    %c0_i32_1 = arith.constant 0 : i32
    return %c0_i32, %c0_i32_0 : i32, i32
  }
  func.func @transform_6(%arg0: i32) -> (i32, i32) {
    %c0_i32 = arith.constant 0 : i32
    %c0_i32_0 = arith.constant 0 : i32
    %c0_i32_1 = arith.constant 0 : i32
    return %c0_i32, %c0_i32_0 : i32, i32
  }
  func.func @transform_7(%arg0: i32) -> (i32, i32, i32) {
    %c0_i32 = arith.constant 0 : i32
    %c0_i32_0 = arith.constant 0 : i32
    %c0_i32_1 = arith.constant 0 : i32
    return %arg0, %c0_i32, %c0_i32_0 : i32, i32, i32
  }
}

module attributes {stable_mosaic.version = 11 : i64} {
  func.func @_ffn_block_kernel(%arg0: i32, %arg1: memref<16x32xf32, #tpu.memory_space<vmem>>, %arg2: memref<32x64xbf16, #tpu.memory_space<vmem>>, %arg3: memref<1x64xf32, #tpu.memory_space<vmem>>, %arg4: memref<64x32xbf16, #tpu.memory_space<vmem>>, %arg5: memref<1x32xf32, #tpu.memory_space<vmem>>, %arg6: memref<1x32xf32, #tpu.memory_space<vmem>>, %arg7: memref<1x32xf32, #tpu.memory_space<vmem>>, %arg8: memref<16x32xf32, #tpu.memory_space<vmem>>) attributes {dimension_semantics = [#tpu.dimension_semantics<parallel>], iteration_bounds = array<i64: 1>, scalar_prefetch = 0 : i64, scratch_operands = 0 : i64, tpu.core_type = #tpu.core_type<tc>, window_params = [{transform_indices = @transform_0, window_bounds = array<i64: 16, 32>}, {pipeline_mode = #tpu.pipeline_mode<synchronous>, transform_indices = @transform_1, window_bounds = array<i64: 32, 64>}, {pipeline_mode = #tpu.pipeline_mode<synchronous>, transform_indices = @transform_2, window_bounds = array<i64: 1, 64>}, {pipeline_mode = #tpu.pipeline_mode<synchronous>, transform_indices = @transform_3, window_bounds = array<i64: 64, 32>}, {pipeline_mode = #tpu.pipeline_mode<synchronous>, transform_indices = @transform_4, window_bounds = array<i64: 1, 32>}, {pipeline_mode = #tpu.pipeline_mode<synchronous>, transform_indices = @transform_5, window_bounds = array<i64: 1, 32>}, {pipeline_mode = #tpu.pipeline_mode<synchronous>, transform_indices = @transform_6, window_bounds = array<i64: 1, 32>}, {transform_indices = @transform_7, window_bounds = array<i64: 16, 32>}]} {
    %c0 = arith.constant 0 : index
    %c0_0 = arith.constant 0 : index
    %0 = vector.load %arg1[%c0, %c0_0] : memref<16x32xf32, #tpu.memory_space<vmem>>, vector<16x32xf32>
    %1 = arith.truncf %0 : vector<16x32xf32> to vector<16x32xbf16>
    %c0_1 = arith.constant 0 : index
    %c0_2 = arith.constant 0 : index
    %2 = vector.load %arg2[%c0_1, %c0_2] : memref<32x64xbf16, #tpu.memory_space<vmem>>, vector<32x64xbf16>
    %cst = arith.constant dense<0.000000e+00> : vector<16x64xf32>
    %3 = tpu.matmul %1, %2, %cst {dimension_numbers = #tpu.dot_dimension_numbers<[1], [0], [0], [1], [0, 0, 1, 1], [], []>} : vector<16x32xbf16>, vector<32x64xbf16>, vector<16x64xf32> -> vector<16x64xf32>
    %c0_3 = arith.constant 0 : index
    %c0_4 = arith.constant 0 : index
    %4 = vector.load %arg3[%c0_3, %c0_4] : memref<1x64xf32, #tpu.memory_space<vmem>>, vector<1x64xf32>
    %5 = vector.broadcast %4 : vector<1x64xf32> to vector<16x64xf32>
    %6 = arith.addf %3, %5 : vector<16x64xf32>
    %cst_5 = arith.constant 0.000000e+00 : f32
    %7 = vector.broadcast %cst_5 : f32 to vector<16x64xf32>
    %8 = arith.maximumf %6, %7 : vector<16x64xf32>
    %9 = arith.truncf %8 : vector<16x64xf32> to vector<16x64xbf16>
    %c0_6 = arith.constant 0 : index
    %c0_7 = arith.constant 0 : index
    %10 = vector.load %arg4[%c0_6, %c0_7] : memref<64x32xbf16, #tpu.memory_space<vmem>>, vector<64x32xbf16>
    %cst_8 = arith.constant dense<0.000000e+00> : vector<16x32xf32>
    %11 = tpu.matmul %9, %10, %cst_8 {dimension_numbers = #tpu.dot_dimension_numbers<[1], [0], [0], [1], [0, 0, 1, 1], [], []>} : vector<16x64xbf16>, vector<64x32xbf16>, vector<16x32xf32> -> vector<16x32xf32>
    %c0_9 = arith.constant 0 : index
    %c0_10 = arith.constant 0 : index
    %12 = vector.load %arg5[%c0_9, %c0_10] : memref<1x32xf32, #tpu.memory_space<vmem>>, vector<1x32xf32>
    %13 = vector.broadcast %12 : vector<1x32xf32> to vector<16x32xf32>
    %14 = arith.addf %11, %13 : vector<16x32xf32>
    %15 = arith.addf %0, %14 : vector<16x32xf32>
    %cst_11 = arith.constant dense<0.000000e+00> : vector<16xf32>
    %16 = vector.multi_reduction <add>, %15, %cst_11 [1] : vector<16x32xf32> to vector<16xf32>
    %17 = vector.shape_cast %16 : vector<16xf32> to vector<16x1xf32>
    %cst_12 = arith.constant 3.200000e+01 : f32
    %18 = vector.broadcast %cst_12 : f32 to vector<16x1xf32>
    %19 = arith.divf %17, %18 : vector<16x1xf32>
    %20 = vector.broadcast %19 : vector<16x1xf32> to vector<16x32xf32>
    %21 = arith.subf %15, %20 : vector<16x32xf32>
    %22 = arith.mulf %21, %21 : vector<16x32xf32>
    %cst_13 = arith.constant dense<0.000000e+00> : vector<16xf32>
    %23 = vector.multi_reduction <add>, %22, %cst_13 [1] : vector<16x32xf32> to vector<16xf32>
    %24 = vector.shape_cast %23 : vector<16xf32> to vector<16x1xf32>
    %cst_14 = arith.constant 3.200000e+01 : f32
    %25 = vector.broadcast %cst_14 : f32 to vector<16x1xf32>
    %26 = arith.divf %24, %25 : vector<16x1xf32>
    %cst_15 = arith.constant 9.99999997E-7 : f32
    %27 = vector.broadcast %cst_15 : f32 to vector<16x1xf32>
    %28 = arith.addf %26, %27 : vector<16x1xf32>
    %29 = math.rsqrt %28 : vector<16x1xf32>
    %30 = vector.broadcast %29 : vector<16x1xf32> to vector<16x32xf32>
    %31 = arith.mulf %21, %30 : vector<16x32xf32>
    %c0_16 = arith.constant 0 : index
    %c0_17 = arith.constant 0 : index
    %32 = vector.load %arg6[%c0_16, %c0_17] : memref<1x32xf32, #tpu.memory_space<vmem>>, vector<1x32xf32>
    %33 = vector.broadcast %32 : vector<1x32xf32> to vector<16x32xf32>
    %34 = arith.mulf %31, %33 : vector<16x32xf32>
    %c0_18 = arith.constant 0 : index
    %c0_19 = arith.constant 0 : index
    %35 = vector.load %arg7[%c0_18, %c0_19] : memref<1x32xf32, #tpu.memory_space<vmem>>, vector<1x32xf32>
    %36 = vector.broadcast %35 : vector<1x32xf32> to vector<16x32xf32>
    %37 = arith.addf %34, %36 : vector<16x32xf32>
    %c0_20 = arith.constant 0 : index
    %c0_21 = arith.constant 0 : index
    %38 = vector.load %arg8[%c0_20, %c0_21] : memref<16x32xf32, #tpu.memory_space<vmem>>, vector<16x32xf32>
    tpu.vector_store %arg8[%c0_20, %c0_21], %37 {strides = array<i32>} : memref<16x32xf32, #tpu.memory_space<vmem>>, vector<16x32xf32>,
    return
  }
  func.func @transform_0(%arg0: i32) -> (i32, i32) {
    %c0_i32 = arith.constant 0 : i32
    %c0_i32_0 = arith.constant 0 : i32
    return %arg0, %c0_i32 : i32, i32
  }
  func.func @transform_1(%arg0: i32) -> (i32, i32) {
    %c0_i32 = arith.constant 0 : i32
    %c0_i32_0 = arith.constant 0 : i32
    %c0_i32_1 = arith.constant 0 : i32
    return %c0_i32, %c0_i32_0 : i32, i32
  }
  func.func @transform_2(%arg0: i32) -> (i32, i32) {
    %c0_i32 = arith.constant 0 : i32
    %c0_i32_0 = arith.constant 0 : i32
    %c0_i32_1 = arith.constant 0 : i32
    return %c0_i32, %c0_i32_0 : i32, i32
  }
  func.func @transform_3(%arg0: i32) -> (i32, i32) {
    %c0_i32 = arith.constant 0 : i32
    %c0_i32_0 = arith.constant 0 : i32
    %c0_i32_1 = arith.constant 0 : i32
    return %c0_i32, %c0_i32_0 : i32, i32
  }
  func.func @transform_4(%arg0: i32) -> (i32, i32) {
    %c0_i32 = arith.constant 0 : i32
    %c0_i32_0 = arith.constant 0 : i32
    %c0_i32_1 = arith.constant 0 : i32
    return %c0_i32, %c0_i32_0 : i32, i32
  }
  func.func @transform_5(%arg0: i32) -> (i32, i32) {
    %c0_i32 = arith.constant 0 : i32
    %c0_i32_0 = arith.constant 0 : i32
    %c0_i32_1 = arith.constant 0 : i32
    return %c0_i32, %c0_i32_0 : i32, i32
  }
  func.func @transform_6(%arg0: i32) -> (i32, i32) {
    %c0_i32 = arith.constant 0 : i32
    %c0_i32_0 = arith.constant 0 : i32
    %c0_i32_1 = arith.constant 0 : i32
    return %c0_i32, %c0_i32_0 : i32, i32
  }
  func.func @transform_7(%arg0: i32) -> (i32, i32) {
    %c0_i32 = arith.constant 0 : i32
    %c0_i32_0 = arith.constant 0 : i32
    return %arg0, %c0_i32 : i32, i32
  }
}

</mosaic_0001>

<bundles_post_ra>
// kernel: transformer_forward.6
= control target key start
LH: loop header
LB: loop body
LE: loop exit
PB: predicated region body
PF: predicated region fallthrough
CT: control target
= control target key end

     0   :  { %s351_s15 = smov 0   ;;  %s380_s0 = inlined_call_operand.vmem [shape: f32[2,8,32], index: 0, kind: input, shape index: {}]   ;;  %s381_s1 = inlined_call_operand.vmem [shape: bf16[32,32], index: 1, kind: input, shape index: {}]   ;;  %s382_s2 = inlined_call_operand.vmem [shape: f32[1,32], index: 2, kind: input, shape index: {}]   ;;  %s383_s3 = inlined_call_operand.vmem [shape: f32[8,32], index: 3, kind: input, shape index: {}]   ;;  %s384_s4 = inlined_call_operand.vmem [shape: f32[2,8,32], index: 4, kind: output, shape index: {}]  }
   0x1 LB: > { %s289_s16 = sadd.s32 4294967295, %s324_s15   ;;  %p293_p0 = scmp.ge.s32.totalorder %s324_s15, 1  ;;  %s324_s15 = sphi %s351_s15, %s14_s15  }
   0x2   : > { %p161_p1 = scmp.lt.s32.totalorder %s324_s15, 3 }
   0x4   : > { %p162_p2 = pnand %p293_p0, %p161_p1 }
   0x5   : > { %p185_p3 = scmp.lt.s32.totalorder (!%p162_p2), %s289_s16, 1 }
   0x6   : > { %165 = sbr.rel (%p162_p2) target bundleno = 153 (0x99), region = 36 }
   0xb   : > { %v308_v0 = vld [vmem:[%s381_s1 + $0x8] sm:$0xff]  ;;  %v307_v1 = vld [vmem:[%s381_s1] sm:$0xff]  ;;  %s386_s16 = smov (!%p185_p3, %s289_s16), 1  ;;  %vm216_vm0 = vcmask 261120  }
   0xc   : > { %226 = vmatpush.bf16.msra.mxu0 %v308_v0  ;;  %s294_s21 = sshll.u32 %s386_s16, 3  ;;  %v317_v4 = vld [vmem:[%s382_s2] ss:$0 sm:$0xff] }
   0xd   : > { %s188_s24 = scalar_lea.vmem %s380_s0, %s294_s21  ;;  %v233_v6 = vld [vmem:[%s383_s3] sm:$0xff]  ;;  %s192_s5 = scalar_lea.vmem %s384_s4, %s294_s21 }
   0xe   : > { %v194_v2 = vld [vmem:[%s188_s24] sm:$0xff] }
   0xf   : > { %v195_v3 = vpack.c.bf16 %v194_v2, %v194_v2 }
  0x10   : > { %227 = vmatpush.bf16.msra.mxu0 %v307_v1 }
  0x13   : > { %304 = vmatmul.msk.bf16.vlgmr.msra.gmra.mxu0 %vm216_vm0, %v195_v3 }
  0x90   : > { %v229_v5 = vpop.f32.mrf.mxu0 }
  0x91   : > { %v230_v7 = vadd.f32 %v317_v4, %v229_v5 }
  0x93   : > { %v234_v8 = vadd.f32 %v233_v6, %v230_v7 }
  0x95   : > { %235 = vst.msk [vmem:[%s192_s5] sm:$0xff] %vm216_vm0, %v234_v8 }
  0x98   : > { %v231_v9 = vpop.f32.mrf.mxu0 }
  0x99 PF: > { %s14_s15 = sadd.s32 1, %s324_s15  }
  0x9a   : > { %p11_p4 = scmp.ge.s32.totalorder %s14_s15, 4  }
  0x9c   :  { %13 = sbr.rel (!%p11_p4) target bundleno = 1 (0x1), region = 66 }

// kernel: transformer_forward.11
= control target key start
LH: loop header
LB: loop body
LE: loop exit
PB: predicated region body
PF: predicated region fallthrough
CT: control target
= control target key end

     0   :  { %vm37_vm0 = vcmask 261120   ;;  %s106_s1 = inlined_call_operand.vmem [shape: bf16[32,128], index: 1, kind: input, shape index: {}]   ;;  %s107_s0 = inlined_call_operand.vmem [shape: f32[2,32], index: 0, kind: input, shape index: {}]   ;;  %s108_s2 = inlined_call_operand.vmem [shape: f32[1,128], index: 2, kind: input, shape index: {}]   ;;  %s109_s3 = inlined_call_operand.vmem [shape: f32[2,128], index: 3, kind: output, shape index: {}]  }
   0x1   :  { %v69_v0 = vld [vmem:[%s106_s1 + $0x8] sm:$0xff]  ;;  %v68_v1 = vld [vmem:[%s106_s1] sm:$0xff] }
   0x2   :  { %47 = vmatpush.bf16.msra.mxu0 %v69_v0  ;;  %v15_v2 = vld [vmem:[%s107_s0] sm:$0x3] }
   0x3   :  { %v16_v3 = vpack.c.bf16 %v15_v2, %v15_v2  ;;  %v70_v4 = vld [vmem:[%s108_s2] ss:$0 sm:$0xff] }
   0x6   :  { %48 = vmatpush.bf16.msra.mxu0 %v68_v1 }
   0x9   :  { %67 = vmatmul.msk.bf16.vlgmr.msra.gmra.mxu0 %vm37_vm0, %v16_v3 }
  0x86   :  { %v50_v5 = vpop.f32.mrf.mxu0 }
  0x87   :  { %v51_v6 = vadd.f32 %v70_v4, %v50_v5 }
  0x89   :  { %54 = vst [vmem:[%s109_s3] sm:$0x3] %v51_v6 }
  0x8e   :  { %v52_v7 = vpop.f32.mrf.mxu0 }

// kernel: transformer_forward.8
= control target key start
LH: loop header
LB: loop body
LE: loop exit
PB: predicated region body
PF: predicated region fallthrough
CT: control target
= control target key end

     0   :  { %vm50_vm0 = vcmask 261120   ;;  %vm107_vm1 = vcmask 523264   ;;  %v239_v26 = vmov 32.0   ;;  %s329_s1 = inlined_call_operand.vmem [shape: bf16[32,64], index: 1, kind: input, shape index: {}]   ;;  %s330_s0 = inlined_call_operand.vmem [shape: f32[16,32], index: 0, kind: input, shape index: {}]   ;;  %s331_s2 = inlined_call_operand.vmem [shape: f32[1,64], index: 2, kind: input, shape index: {}]   ;;  %s332_s4 = inlined_call_operand.vmem [shape: f32[1,32], index: 4, kind: input, shape index: {}]   ;;  %s333_s3 = inlined_call_operand.vmem [shape: bf16[64,32], index: 3, kind: input, shape index: {}]   ;;  %s334_s5 = inlined_call_operand.vmem [shape: f32[1,32], index: 5, kind: input, shape index: {}]   ;;  %s335_s6 = inlined_call_operand.vmem [shape: f32[1,32], index: 6, kind: input, shape index: {}]   ;;  %s336_s7 = inlined_call_operand.vmem [shape: f32[16,32], index: 7, kind: output, shape index: {}]  }
   0x1   :  { %v223_v0 = vld [vmem:[%s329_s1 + $0x8] sm:$0xff]  ;;  %v222_v1 = vld [vmem:[%s329_s1] sm:$0xff]  ;;  %v227_v5 = vld [vmem:[%s333_s3 + $0x18] sm:$0xff]  ;;  %233 = vrcp.f32 %v239_v26 }
   0x2   :  { %60 = vmatpush.bf16.msra.mxu0 %v223_v0  ;;  %v27_v2 = vld [vmem:[%s330_s0] sm:$0xff]  ;;  %v28_v3 = vld [vmem:[%s330_s0 + $0x8] sm:$0xff]  ;;  %115 = vmatpush.bf16.msra.mxu1 %v227_v5  ;;  %v226_v6 = vld [vmem:[%s333_s3 + $0x10] sm:$0xff] }
   0x3   :  { %v29_v4 = vpack.c.bf16 %v28_v3, %v27_v2  ;;  %v225_v7 = vld [vmem:[%s333_s3 + $0x8] sm:$0xff]  ;;  %v224_v8 = vld [vmem:[%s333_s3] sm:$0xff] }
   0x4   :  { %v229_v10 = vld [vmem:[%s331_s2] ss:$0 sm:$0xff] }
   0x5   :  { %v230_v17 = vld [vmem:[%s332_s4] ss:$0 sm:$0xff] }
   0x6   :  { %61 = vmatpush.bf16.msra.mxu0 %v222_v1  ;;  %116 = vmatpush.bf16.msra.mxu1 %v226_v6  ;;  %v231_v57 = vld [vmem:[%s334_s5] ss:$0 sm:$0xff] }
   0x7   :  { %v234_v27 = vpop.eup %233  ;;  %v232_v60 = vld [vmem:[%s335_s6] ss:$0 sm:$0xff] }
   0x8   :  { %v134_v28 = vmul.f32 32.0, %v234_v27  ;;  %vm138_vm2 = vweird.f32 %v234_v27 }
   0x9   :  { %204 = vmatmul.msk.bf16.vlgmr.msra.gmra.mxu0 %vm50_vm0, %v29_v4 }
   0xa   :  { %117 = vmatpush.bf16.msra.mxu1 %v225_v7  ;;  %v135_v29 = vsub.f32 1.0, %v134_v28 }
   0xc   :  { %v136_v30 = vmul.f32 %v234_v27, %v135_v29 }
   0xe   :  { %118 = vmatpush.bf16.msra.mxu1 %v224_v8  ;;  %v137_v31 = vadd.f32 %v234_v27, %v136_v30 }
  0x10   :  { %v139_v32 = vsel %vm138_vm2, %v234_v27, %v137_v31 }
  0x86   :  { %v63_v9 = vpop.f32.mrf.mxu0 }
  0x87   :  { %v64_v11 = vadd.f32 %v229_v10, %v63_v9 }
  0x89   :  { %v68_v14 = vmax.f32 %v64_v11, 0.0 }
  0x8e   :  { %v65_v12 = vpop.f32.mrf.mxu0 }
  0x8f   :  { %v66_v13 = vadd.f32 %v229_v10, %v65_v12 }
  0x91   :  { %v69_v15 = vmax.f32 %v66_v13, 0.0 }
  0x93   :  { %v70_v16 = vpack.c.bf16 %v69_v15, %v68_v14 }
  0x95   :  { %221 = vmatmul.msk.bf16.vlgmr.msra.gmra.mxu1 %vm107_vm1, %v70_v16 }
 0x112   :  { %v120_v18 = vpop.f32.mrf.mxu1 }
 0x113   :  { %v121_v19 = vadd.f32 %v230_v17, %v120_v18 }
 0x115   :  { %v125_v20 = vadd.f32 %v121_v19, %v27_v2 }
 0x117   :  { %v127_v21 = vsel %vm50_vm0, %v125_v20, 0.0 }
 0x118   :  { %128 = vadd.xlane.f32.xlu0 %v127_v21 }
 0x11a   :  { %v122_v22 = vpop.f32.mrf.mxu1 }
 0x11b   :  { %v123_v23 = vadd.f32 %v230_v17, %v122_v22 }
 0x11d   :  { %v126_v24 = vadd.f32 %v123_v23, %v28_v3 }
 0x11f   :  { %v130_v25 = vsel %vm50_vm0, %v126_v24, 0.0 }
 0x120   :  { %131 = vadd.xlane.f32.xlu0 %v130_v25 }
 0x18b   :  { %v129_v33 = vpop.xlane.xlu0 %128 }
 0x18c   :  { %v140_v34 = vmul.f32 %v139_v32, %v129_v33 }
 0x18e   :  { %v142_v35 = vsub.f32 %v125_v20, %v140_v34 }
 0x190   :  { %v144_v36 = vmul.f32 %v142_v35, %v142_v35 }
 0x192   :  { %v146_v37 = vsel %vm50_vm0, %v144_v36, 0.0 }
 0x193   :  { %147 = vadd.xlane.f32.xlu1 %v146_v37  ;;  %v132_v38 = vpop.xlane.xlu0 %131 }
 0x194   :  { %v141_v39 = vmul.f32 %v139_v32, %v132_v38 }
 0x196   :  { %v143_v40 = vsub.f32 %v126_v24, %v141_v39 }
 0x198   :  { %v145_v41 = vmul.f32 %v143_v40, %v143_v40 }
 0x19a   :  { %v149_v42 = vsel %vm50_vm0, %v145_v41, 0.0 }
 0x19b   :  { %150 = vadd.xlane.f32.xlu1 %v149_v42 }
 0x206   :  { %v148_v43 = vpop.xlane.xlu1 %147 }
 0x207   :  { %v152_v44 = vmul.f32 %v148_v43, %v139_v32 }
 0x209   :  { %v154_v45 = vadd.f32 1e-06, %v152_v44 }
 0x20b   :  { %235 = vrsqrt.f32 %v154_v45  ;;  %vm162_vm4 = vweird.f32 %v154_v45 }
 0x20e   :  { %v151_v46 = vpop.xlane.xlu1 %150 }
 0x20f   :  { %v153_v47 = vmul.f32 %v151_v46, %v139_v32 }
 0x211   :  { %v236_v48 = vpop.eup %235  ;;  %v155_v49 = vadd.f32 1e-06, %v153_v47 }
 0x212   :  { %v157_v50 = vmul.f32 %v236_v48, %v154_v45  ;;  %vm163_vm3 = vweird.f32 %v236_v48 }
 0x213   :  { %237 = vrsqrt.f32 %v155_v49  ;;  %vm164_vm5 = vmor %vm162_vm4, %vm163_vm3  ;;  %vm172_vm7 = vweird.f32 %v155_v49 }
 0x214   :  { %v158_v51 = vmul.f32 %v236_v48, %v157_v50 }
 0x216   :  { %v159_v52 = vmul.f32 0.5, %v158_v51 }
 0x218   :  { %v160_v53 = vsub.f32 1.5, %v159_v52 }
 0x219   :  { %v238_v54 = vpop.eup %237 }
 0x21a   :  { %v161_v55 = vmul.f32 %v236_v48, %v160_v53  ;;  %v167_v56 = vmul.f32 %v238_v54, %v155_v49  ;;  %vm173_vm6 = vweird.f32 %v238_v54 }
 0x21b   :  { %vm174_vm8 = vmor %vm172_vm7, %vm173_vm6 }
 0x21c   :  { %v165_v58 = vsel %vm164_vm5, %v236_v48, %v161_v55  ;;  %v168_v59 = vmul.f32 %v238_v54, %v167_v56 }
 0x21d   :  { %v176_v61 = vmul.f32 %v165_v58, %v142_v35 }
 0x21e   :  { %v169_v62 = vmul.f32 0.5, %v168_v59 }
 0x21f   :  { %v182_v63 = vmul.f32 %v231_v57, %v176_v61 }
 0x220   :  { %v170_v0 = vsub.f32 1.5, %v169_v62 }
 0x221   :  { %v188_v1 = vadd.f32 %v232_v60, %v182_v63 }
 0x222   :  { %v171_v2 = vmul.f32 %v238_v54, %v170_v0 }
 0x223   :  { %190 = vst.msk [vmem:[%s336_s7] sm:$0xff] %vm50_vm0, %v188_v1 }
 0x224   :  { %v175_v3 = vsel %vm174_vm8, %v238_v54, %v171_v2 }
 0x225   :  { %v177_v4 = vmul.f32 %v175_v3, %v143_v40 }
 0x227   :  { %v183_v5 = vmul.f32 %v231_v57, %v177_v4 }
 0x229   :  { %v189_v6 = vadd.f32 %v232_v60, %v183_v5 }
 0x22b   :  { %191 = vst.msk [vmem:[%s336_s7 + $0x8] sm:$0xff] %vm50_vm0, %v189_v6 }

// kernel: transformer_forward.7
= control target key start
LH: loop header
LB: loop body
LE: loop exit
PB: predicated region body
PF: predicated region fallthrough
CT: control target
= control target key end

     0   :  { %s841_s24 = smov 0   ;;  %s938_s0 = inlined_call_operand.vmem [shape: f32[2,8,32], index: 0, kind: input, shape index: {}]   ;;  %s939_s1 = inlined_call_operand.vmem [shape: bf16[32,96], index: 1, kind: input, shape index: {}]   ;;  %s940_s2 = inlined_call_operand.vmem [shape: f32[1,96], index: 2, kind: input, shape index: {}]   ;;  %s941_s3 = inlined_call_operand.vmem [shape: bf16[32,32], index: 3, kind: input, shape index: {}]   ;;  %s942_s4 = inlined_call_operand.vmem [shape: f32[1,32], index: 4, kind: input, shape index: {}]   ;;  %s943_s5 = inlined_call_operand.vmem [shape: f32[1,32], index: 5, kind: input, shape index: {}]   ;;  %s944_s6 = inlined_call_operand.vmem [shape: f32[1,32], index: 6, kind: input, shape index: {}]   ;;  %s945_s7 = inlined_call_operand.vmem [shape: f32[2,8,32], index: 7, kind: output, shape index: {}]  }
   0x1 LB: > { %s692_s25 = sadd.s32 4294967295, %s784_s24   ;;  %p696_p0 = scmp.ge.s32.totalorder %s784_s24, 1  ;;  %s784_s24 = sphi %s841_s24, %s17_s24  }
   0x2   : > { %p236_p1 = scmp.lt.s32.totalorder %s784_s24, 3 }
   0x4   : > { %p237_p2 = pnand %p696_p0, %p236_p1 }
   0x5   : > { %p266_p3 = scmp.lt.s32.totalorder (!%p237_p2), %s692_s25, 1  ;;  %s786_s13 = smov (!%p237_p2), 104  }
   0x6   : > { %240 = sbr.rel (%p237_p2) target bundleno = 1352 (0x548), region = 48  ;;  %s787_s14 = smov (!%p237_p2), 120  }
   0x7   : > { %s788_s15 = smov (!%p237_p2), 96   ;;  %s789_s16 = smov (!%p237_p2), 80  }
   0x8   : > { %s790_s17 = smov (!%p237_p2), 72   ;;  %s791_s18 = smov (!%p237_p2), 88  }
   0x9   : > { %s792_s19 = smov (!%p237_p2), 112   ;;  %s793_s20 = smov (!%p237_p2), 64  }
   0xa   : > { %s794_s21 = smov (!%p237_p2), 40   ;;  %s795_s22 = smov (!%p237_p2), 56  }
   0xb   : > { %v728_v0 = vld [vmem:[%s939_s1 + $0x8] sm:$0xff]  ;;  %v727_v1 = vld [vmem:[%s939_s1] sm:$0xff]  ;;  %s947_s25 = smov (!%p266_p3, %s692_s25), 1  ;;  %vm297_vm0 = vcmask 261120   ;;  %vm318_vm1 = vcmask 64512   ;;  %vm356_vm2 = vcmask 1043456  }
   0xc   : > { %307 = vmatpush.bf16.msra.mxu0 %v728_v0  ;;  %s697_s30 = sshll.u32 %s947_s25, 3  ;;  %v754_v4 = vld [vmem:[%s940_s2] ss:$0 sm:$0xff]  ;;  %s796_s23 = smov 48   ;;  %vm557_vm3 = vcmask 130048   ;;  %vm559_vm4 = vcmask 195584  }
   0xd   : > { %s269_s10 = scalar_lea.vmem %s938_s0, %s697_s30  ;;  %s797_s26 = smov 8  }
   0xe   : > { %v863_v2 = vld [vmem:[%s269_s10] sm:$0xff]  ;;  %s798_s27 = smov 16   ;;  %s799_s28 = smov 24  }
   0xf   : > { %v276_v3 = vpack.c.bf16 %v863_v2, %v863_v2 }
  0x10   : > { %308 = vmatpush.bf16.msra.mxu0 %v727_v1 }
  0x13   : > { %707 = vmatmul.msk.bf16.vlgmr.msra.gmra.mxu0 %vm297_vm0, %v276_v3 }
  0x90   : > { %v310_v5 = vpop.f32.mrf.mxu0 }
  0x91   : > { %v311_v6 = vadd.f32 %v754_v4, %v310_v5 }
  0x93   : > { %v871_v7 = vpack.c.bf16 %v311_v6, %v311_v6 }
  0x95   : > { %487 = vrot.lane.b32.xlu2 %v871_v7, %s786_s13  ;;  %373 = vrot.lane.b32.xlu1 %v871_v7, %s787_s14 }
  0x96   : > { %316 = vrot.lane.b32.xlu0 %v871_v7, %s788_s15 }
  0x98   : > { %v312_v8 = vpop.f32.mrf.mxu0 }
  0x9d   : > { %432 = vrot.lane.b32.xlu2 %v871_v7, %s789_s16  ;;  %489 = vrot.lane.b32.xlu1 %v871_v7, %s790_s17 }
  0x9e   : > { %375 = vrot.lane.b32.xlu0 %v871_v7, %s791_s18 }
  0xa6   : > { %430 = vrot.lane.b32.xlu0 %v871_v7, %s792_s19  ;;  %s273_s19 = scalar_lea.vmem %s945_s7, %s697_s30 }
  0xef   : > { %v488_v9 = vpop.permute.xlu2 %487 }
  0xf7   : > { %v433_v10 = vpop.permute.xlu2 %432 }
  0xf8   : > { %v438_v11 = vsel %vm318_vm1, %v433_v10, 0 }
  0xf9   : > { %447 = vmatpush.bf16.xpose.msrb.mxu0 %v438_v11 }
 0x107   : > { %v374_v12 = vpop.permute.xlu1 %373 }
 0x108   : > { %v317_v13 = vpop.permute.xlu0 %316 }
 0x109   : > { %v323_v14 = vsel %vm318_vm1, %v317_v13, 0 }
 0x10a   : > { %332 = vmatpush.bf16.xpose.msra.mxu1 %v323_v14 }
 0x10f   : > { %v490_v15 = vpop.permute.xlu1 %489 }
 0x110   : > { %v376_v16 = vpop.permute.xlu0 %375  ;;  %v495_v17 = vsel %vm318_vm1, %v490_v15, 0 }
 0x111   : > { %708 = vmatmul.msk.bf16.vlgmr.msra.gmra.mxu1 %vm318_vm1, %v871_v7  ;;  %v381_v18 = vsel %vm318_vm1, %v376_v16, 0 }
 0x112   : > { %390 = vmatpush.bf16.xpose.msra.mxu3 %v381_v18 }
 0x118   : > { %v431_v19 = vpop.permute.xlu0 %430 }
 0x119   : > { %710 = vmatmul.msk.bf16.vlgmr.msra.gmra.mxu3 %vm318_vm1, %v374_v12  ;;  %712 = vmatmul.msk.bf16.vlgmr.msrb.gmra.mxu0 %vm318_vm1, %v431_v19 }
 0x11a   : > { %504 = vmatpush.bf16.xpose.msrb.mxu3 %v495_v17 }
 0x129   : > { %714 = vmatmul.msk.bf16.vlgmr.msrb.gmra.mxu3 %vm318_vm1, %v488_v9 }
 0x18e   : > { %v334_v20 = vpop.f32.mrf.mxu1 }
 0x18f   : > { %v338_v21 = vmul.f32 0.35355338, %v334_v20 }
 0x191   : > { %v339_v22 = vsel %vm318_vm1, %v338_v21, -inf }
 0x192   : > { %340 = vmax.xlane.f32.xlu1 %v339_v22 }
 0x196   : > { %v336_v23 = vpop.f32.mrf.mxu1  ;;  %v449_v24 = vpop.f32.mrf.mxu0 }
 0x197   : > { %v453_v29 = vmul.f32 0.35355338, %v449_v24 }
 0x199   : > { %v454_v31 = vsel %vm318_vm1, %v453_v29, -inf }
 0x19c   : > { %v392_v25 = vpop.f32.mrf.mxu3 }
 0x19d   : > { %v396_v26 = vmul.f32 0.35355338, %v392_v25  ;;  %v730_v25 = vld [vmem:[%s941_s3 + $0x8] sm:$0xff] }
 0x19e   : > { %v451_v27 = vpop.f32.mrf.mxu0  ;;  %591 = vmatpush.bf16.msra.mxu0 %v730_v25 }
 0x19f   : > { %v397_v28 = vsel %vm318_vm1, %v396_v26, -inf }
 0x1a0   : > { %398 = vmax.xlane.f32.xlu2 %v397_v28 }
 0x1a4   : > { %v394_v30 = vpop.f32.mrf.mxu3 }
 0x1a8   : > { %455 = vmax.xlane.f32.xlu2 %v454_v31 }
 0x1ac   : > { %v506_v32 = vpop.f32.mrf.mxu3 }
 0x1ad   : > { %v510_v33 = vmul.f32 0.35355338, %v506_v32 }
 0x1af   : > { %v511_v34 = vsel %vm318_vm1, %v510_v33, -inf }
 0x1b0   : > { %512 = vmax.xlane.f32.xlu0 %v511_v34  ;;  %v755_v34 = vld [vmem:[%s942_s4] ss:$0 sm:$0xff] }
 0x1b4   : > { %v508_v35 = vpop.f32.mrf.mxu3 }
 0x1c0   : > { %351 = vrot.lane.b32.xlu2 %v871_v7, %s793_s20 }
 0x1c8   : > { %523 = vrot.lane.b32.xlu2 %v871_v7, %s794_s21 }
 0x205   : > { %v341_v36 = vpop.xlane.xlu1 %340 }
 0x206   : > { %v342_v37 = vsub.f32 %v338_v21, %v341_v36 }
 0x208   : > { %v343_v38 = vmul.f32 1.442695, %v342_v37 }
 0x20a   : > { %758 = vpow2.f32 %v343_v38 }
 0x210   : > { %v759_v39 = vpop.eup %758 }
 0x211   : > { %v345_v40 = vsel %vm318_vm1, %v759_v39, 0.0 }
 0x212   : > { %346 = vadd.xlane.f32.xlu1 %v345_v40  ;;  %v800_v40 = vmov 32.0  }
 0x213   : > { %v399_v41 = vpop.xlane.xlu2 %398 }
 0x214   : > { %v400_v44 = vsub.f32 %v396_v26, %v399_v41  ;;  %v729_v26 = vld [vmem:[%s941_s3] sm:$0xff] }
 0x215   : > { %592 = vmatpush.bf16.msra.mxu0 %v729_v26 }
 0x216   : > { %v401_v46 = vmul.f32 1.442695, %v400_v44 }
 0x21b   : > { %v456_v42 = vpop.xlane.xlu2 %455 }
 0x21c   : > { %v457_v43 = vsub.f32 %v453_v29, %v456_v42 }
 0x21e   : > { %v458_v45 = vmul.f32 1.442695, %v457_v43 }
 0x220   : > { %760 = vpow2.f32 %v458_v45 }
 0x221   : > { %762 = vpow2.f32 %v401_v46 }
 0x223   : > { %v352_v47 = vpop.permute.xlu2 %351  ;;  %v513_v48 = vpop.xlane.xlu0 %512 }
 0x224   : > { %v358_v49 = vsel %vm356_vm2, %v352_v47, 0  ;;  %v514_v51 = vsub.f32 %v510_v33, %v513_v48 }
 0x225   : > { %367 = vmatpush.bf16.msra.mxu2 %v358_v49 }
 0x226   : > { %v761_v50 = vpop.eup %760  ;;  %v515_v53 = vmul.f32 1.442695, %v514_v51 }
 0x227   : > { %v460_v52 = vsel %vm318_vm1, %v761_v50, 0.0  ;;  %v763_v54 = vpop.eup %762 }
 0x228   : > { %461 = vadd.xlane.f32.xlu0 %v460_v52  ;;  %764 = vpow2.f32 %v515_v53  ;;  %v403_v55 = vsel %vm318_vm1, %v763_v54, 0.0 }
 0x22b   : > { %409 = vrot.lane.b32.xlu1 %v871_v7, %s795_s22  ;;  %v524_v63 = vpop.permute.xlu2 %523 }
 0x22c   : > { %v529_v3 = vsel %vm356_vm2, %v524_v63, 0 }
 0x22e   : > { %v765_v56 = vpop.eup %764 }
 0x22f   : > { %v517_v57 = vsel %vm318_vm1, %v765_v56, 0.0 }
 0x230   : > { %404 = vadd.xlane.f32.xlu0 %v403_v55 }
 0x238   : > { %518 = vadd.xlane.f32.xlu0 %v517_v57 }
 0x24c   : > { %466 = vrot.lane.b32.xlu0 %v871_v7, %s796_s23 }
 0x285   : > { %v347_v58 = vpop.xlane.xlu1 %346 }
 0x286   : > { %766 = vrcp.f32 %v347_v58 }
 0x28c   : > { %v767_v59 = vpop.eup %766 }
 0x28d   : > { %v349_v60 = vmul.f32 %v767_v59, %v759_v39 }
 0x28f   : > { %v350_v61 = vpack.c.bf16 %v349_v60, %v349_v60  ;;  %v756_v60 = vld [vmem:[%s943_s5] ss:$0 sm:$0xff] }
 0x291   : > { %709 = vmatmul.msk.bf16.vlgmr.msra.gmra.mxu2 %vm318_vm1, %v350_v61 }
 0x29b   : > { %v462_v62 = vpop.xlane.xlu0 %461 }
 0x29d   : > { %v410_v0 = vpop.permute.xlu1 %409 }
 0x29e   : > { %v415_v1 = vsel %vm356_vm2, %v410_v0, 0 }
 0x29f   : > { %424 = vmatpush.bf16.msrb.mxu2 %v415_v1 }
 0x2a3   : > { %538 = vmatpush.bf16.msra.mxu2 %v529_v3  ;;  %v405_v4 = vpop.xlane.xlu0 %404 }
 0x2a4   : > { %768 = vrcp.f32 %v405_v4 }
 0x2aa   : > { %v769_v5 = vpop.eup %768 }
 0x2ab   : > { %v407_v6 = vmul.f32 %v769_v5, %v763_v54  ;;  %v519_v7 = vpop.xlane.xlu0 %518 }
 0x2ac   : > { %770 = vrcp.f32 %v519_v7 }
 0x2ad   : > { %v408_v8 = vpack.c.bf16 %v407_v6, %v407_v6  ;;  %772 = vrcp.f32 %v462_v62  ;;  %v757_v62 = vld [vmem:[%s944_s6] ss:$0 sm:$0xff] }
 0x2ae   : > { %774 = vrcp.f32 %v800_v40 }
 0x2af   : > { %711 = vmatmul.msk.bf16.vlgmr.msrb.gmra.mxu2 %vm318_vm1, %v408_v8 }
 0x2b2   : > { %v771_v9 = vpop.eup %770 }
 0x2b3   : > { %v521_v10 = vmul.f32 %v771_v9, %v765_v56  ;;  %v773_v11 = vpop.eup %772 }
 0x2b4   : > { %v464_v12 = vmul.f32 %v773_v11, %v761_v50  ;;  %v775_v41 = vpop.eup %774 }
 0x2b5   : > { %v522_v13 = vpack.c.bf16 %v521_v10, %v521_v10  ;;  %v603_v42 = vmul.f32 32.0, %v775_v41  ;;  %vm607_vm5 = vweird.f32 %v775_v41 }
 0x2b6   : > { %v465_v16 = vpack.c.bf16 %v464_v12, %v464_v12 }
 0x2b7   : > { %v604_v43 = vsub.f32 1.0, %v603_v42 }
 0x2b9   : > { %v605_v44 = vmul.f32 %v775_v41, %v604_v43 }
 0x2bb   : > { %v606_v45 = vadd.f32 %v775_v41, %v605_v44 }
 0x2bd   : > { %v608_v46 = vsel %vm607_vm5, %v775_v41, %v606_v45 }
 0x2be   : > { %v467_v14 = vpop.permute.xlu0 %466 }
 0x2bf   : > { %715 = vmatmul.msk.bf16.vlgmr.msra.gmra.mxu2 %vm318_vm1, %v522_v13  ;;  %v472_v15 = vsel %vm356_vm2, %v467_v14, 0 }
 0x2c0   : > { %481 = vmatpush.bf16.msrb.mxu1 %v472_v15 }
 0x2c3   : > { %713 = vmatmul.msk.bf16.vlgmr.msrb.gmra.mxu1 %vm318_vm1, %v465_v16 }
 0x314   : > { %v369_v17 = vpop.f32.mrf.mxu2 }
 0x31c   : > { %v371_v18 = vpop.f32.mrf.mxu2 }
 0x332   : > { %v426_v19 = vpop.f32.mrf.mxu2 }
 0x333   : > { %545 = vrot.lane.b32.xlu1 %v426_v19, %s797_s26 }
 0x33a   : > { %v428_v20 = vpop.f32.mrf.mxu2 }
 0x340   : > { %v483_v21 = vpop.f32.mrf.mxu1 }
 0x341   : > { %549 = vrot.lane.b32.xlu2 %v483_v21, %s798_s27 }
 0x342   : > { %v540_v22 = vpop.f32.mrf.mxu2 }
 0x343   : > { %553 = vrot.lane.b32.xlu1 %v540_v22, %s799_s28 }
 0x348   : > { %v485_v23 = vpop.f32.mrf.mxu1 }
 0x34a   : > { %v542_v24 = vpop.f32.mrf.mxu2 }
 0x39b   : > { %v550_v29 = vpop.permute.xlu2 %549 }
 0x3a5   : > { %v546_v27 = vpop.permute.xlu1 %545 }
 0x3a6   : > { %v556_v28 = vsel %vm318_vm1, %v369_v17, %v546_v27 }
 0x3a7   : > { %v558_v31 = vsel %vm557_vm3, %v556_v28, %v550_v29 }
 0x3b5   : > { %v554_v30 = vpop.permute.xlu1 %553 }
 0x3b6   : > { %v560_v32 = vsel %vm559_vm4, %v558_v31, %v554_v30 }
 0x3b7   : > { %v561_v33 = vpack.c.bf16 %v560_v32, %v560_v32 }
 0x3b9   : > { %724 = vmatmul.msk.bf16.vlgmr.msra.gmra.mxu0 %vm297_vm0, %v561_v33 }
 0x436   : > { %v594_v35 = vpop.f32.mrf.mxu0 }
 0x437   : > { %v595_v36 = vadd.f32 %v755_v34, %v594_v35 }
 0x439   : > { %v598_v37 = vadd.f32 %v595_v36, %v863_v2 }
 0x43b   : > { %v599_v38 = vsel %vm297_vm0, %v598_v37, 0.0 }
 0x43c   : > { %600 = vadd.xlane.f32.xlu2 %v599_v38 }
 0x43e   : > { %v596_v39 = vpop.f32.mrf.mxu0 }
 0x4af   : > { %v601_v47 = vpop.xlane.xlu2 %600 }
 0x4b0   : > { %v609_v48 = vmul.f32 %v608_v46, %v601_v47 }
 0x4b2   : > { %v610_v49 = vsub.f32 %v598_v37, %v609_v48 }
 0x4b4   : > { %v611_v50 = vmul.f32 %v610_v49, %v610_v49 }
 0x4b6   : > { %v612_v51 = vsel %vm297_vm0, %v611_v50, 0.0 }
 0x4b7   : > { %613 = vadd.xlane.f32.xlu1 %v612_v51 }
 0x52a   : > { %v614_v2 = vpop.xlane.xlu1 %613 }
 0x52b   : > { %v615_v52 = vmul.f32 %v614_v2, %v608_v46 }
 0x52d   : > { %v616_v53 = vadd.f32 1e-06, %v615_v52 }
 0x52f   : > { %776 = vrsqrt.f32 %v616_v53  ;;  %vm623_vm7 = vweird.f32 %v616_v53 }
 0x535   : > { %v777_v54 = vpop.eup %776 }
 0x536   : > { %v618_v55 = vmul.f32 %v777_v54, %v616_v53  ;;  %vm624_vm6 = vweird.f32 %v777_v54 }
 0x537   : > { %vm625_vm8 = vmor %vm623_vm7, %vm624_vm6 }
 0x538   : > { %v619_v56 = vmul.f32 %v777_v54, %v618_v55 }
 0x53a   : > { %v620_v57 = vmul.f32 0.5, %v619_v56 }
 0x53c   : > { %v621_v58 = vsub.f32 1.5, %v620_v57 }
 0x53e   : > { %v622_v59 = vmul.f32 %v777_v54, %v621_v58 }
 0x540   : > { %v626_v61 = vsel %vm625_vm8, %v777_v54, %v622_v59 }
 0x541   : > { %v627_v63 = vmul.f32 %v626_v61, %v610_v49 }
 0x543   : > { %v632_v0 = vmul.f32 %v756_v60, %v627_v63 }
 0x545   : > { %v637_v1 = vadd.f32 %v757_v62, %v632_v0 }
 0x547   : > { %638 = vst.msk [vmem:[%s273_s19] sm:$0xff] %vm297_vm0, %v637_v1 }
 0x548 PF: > { %s17_s24 = sadd.s32 1, %s784_s24  }
 0x549   : > { %p14_p4 = scmp.ge.s32.totalorder %s17_s24, 4  }
 0x54b   :  { %16 = sbr.rel (!%p14_p4) target bundleno = 1 (0x1), region = 78 }

</bundles_post_ra>
